<compile_context>
chip_gen: v7x
topology: tpu7x:2x2x1
jax: 0.10.0
libtpu: 0.0.40
codegen_flags: <defaults>
</compile_context>

<pallas_src>
import math
import functools

import jax
import jax.numpy as jnp
from jax import lax
from jax.experimental import pallas as pl
from jax.experimental.pallas import tpu as pltpu


def mha_kernel(x_ref, wqkv_ref, bqkv_ref, wp_ref, bp_ref, o_ref, *,
               n_head, head_size, batch, seq_len):
    nh, hs = n_head, head_size
    B, S = batch, seq_len
    H = x_ref.shape[-1]

    # ---- fused QKV projection over the whole (B*S, H) slab ----
    # One (B*S,H) x (H,3*nh*hs) matmul instead of 3*nh tiny per-head matmuls.
    # 1/sqrt(hs) is already folded into the V columns of wqkv/bqkv.
    x = x_ref[...].astype(jnp.float32)                                 # (B*S, H)
    qkv = jnp.dot(x, wqkv_ref[...], preferred_element_type=jnp.float32)
    qkv = qkv + bqkv_ref[...]                                          # (B*S, 3*nh*hs)

    # Additive causal bias built once per invocation (0 where visible, -1e30
    # where masked). Diagonal is always visible, so rows never fully mask out.
    row = lax.broadcasted_iota(jnp.int32, (S, S), 0)
    col = lax.broadcasted_iota(jnp.int32, (S, S), 1)
    neg = jnp.where(col <= row, 0.0, jnp.float32(-1e30))               # (S, S)

    wp = wp_ref[...]                                                   # (H, H)
    bp = bp_ref[...]                                                   # (1, H)

    for b in range(B):                  # static unroll; B is tiny (2)
        qkv_b = qkv[b * S:(b + 1) * S, :]                              # (S, 3*nh*hs)
        y = jnp.zeros((S, H), jnp.float32)
        for h in range(nh):             # static unroll
            q = qkv_b[:, h * hs:(h + 1) * hs]                          # (S, hs)
            k = qkv_b[:, (nh + h) * hs:(nh + h + 1) * hs]              # (S, hs)
            v = qkv_b[:, (2 * nh + h) * hs:(2 * nh + h + 1) * hs]      # pre-scaled

            # q @ k^T without materializing k.T (contract on dim 1 of both).
            s = lax.dot_general(q, k,
                                dimension_numbers=(((1,), (1,)), ((), ())),
                                preferred_element_type=jnp.float32)    # (S, S)
            s = s + neg                                                # causal bias
            m = jnp.max(s, axis=-1, keepdims=True)
            e = jnp.exp(s - m)
            p = e * pl.reciprocal(jnp.sum(e, axis=-1, keepdims=True), approx=True)
            # dropout(p) is identity in eval mode  # TODO(synk): training-mode dropout not implemented

            out_h = jnp.dot(p, v, preferred_element_type=jnp.float32)  # (S, hs)
            # Accumulate the output projection per head: equivalent to
            # concat(heads) @ wp but avoids lane-sliver concatenation.
            y = y + jnp.dot(out_h, wp[h * hs:(h + 1) * hs, :],
                            preferred_element_type=jnp.float32)

        o_ref[b * S:(b + 1) * S, :] = (y + bp).astype(o_ref.dtype)


def _prepare_params(params, n_head, head_size):
    """Stack per-head weights into one (H, 3*nh*hs) matrix (columns ordered
    [Q heads | K heads | V heads]) and fold 1/sqrt(hs) into the V columns."""
    wq, bq, wk, bk, wv, bv, wp, bp = params
    H = wq.shape[1]
    inv = 1.0 / math.sqrt(head_size)

    def stack_w(w):                               # (nh, H, hs) -> (H, nh*hs)
        return jnp.transpose(w, (1, 0, 2)).reshape(H, n_head * head_size)

    def stack_b(b):                               # (nh, 1, hs) -> (1, nh*hs)
        return b.reshape(1, n_head * head_size)

    wqkv = jnp.concatenate([stack_w(wq), stack_w(wk), stack_w(wv) * inv], axis=1)
    bqkv = jnp.concatenate([stack_b(bq), stack_b(bk), stack_b(bv) * inv], axis=1)
    return wqkv, bqkv, wp, bp


def multi_head_attention(x, params, *, n_head, head_size):
    B, S, H = x.shape
    assert n_head * head_size == H
    wqkv, bqkv, wp, bp = _prepare_params(params, n_head, head_size)

    # Fold batch+seq into the row (sublane) axis outside the kernel (free XLA
    # reshape) so the in-kernel QKV projection covers all B*S rows at once.
    x2 = x.reshape(B * S, H)

    kernel = functools.partial(mha_kernel, n_head=n_head, head_size=head_size,
                               batch=B, seq_len=S)

    def full(a):
        nd = a.ndim
        return pl.BlockSpec(a.shape, lambda *_: (0,) * nd)

    # Single grid step: the whole problem (~40 KB of operands) fits in VMEM,
    # so every extra grid step would only add pipeline overhead.
    out = pl.pallas_call(
        kernel,
        out_shape=jax.ShapeDtypeStruct((B * S, H), x.dtype),
        grid_spec=pltpu.PrefetchScalarGridSpec(
            num_scalar_prefetch=0,
            grid=(1,),
            in_specs=[
                full(x2), full(wqkv), full(bqkv), full(wp), full(bp),
            ],
            out_specs=pl.BlockSpec((B * S, H), lambda *_: (0, 0)),
        ),
        compiler_params=pltpu.CompilerParams(
            dimension_semantics=("arbitrary",)),
    )(x2, wqkv, bqkv, wp, bp)
    return out.reshape(B, S, H)


def init_params(key, hidden_dim, n_head, head_size):
    """Deterministic synthetic init, PyTorch-Linear-style uniform(-1/sqrt(fan_in), +)."""
    ks = jax.random.split(key, 8)
    lim_h = 1.0 / math.sqrt(hidden_dim)
    wq = jax.random.uniform(ks[0], (n_head, hidden_dim, head_size), jnp.float32, -lim_h, lim_h)
    bq = jax.random.uniform(ks[1], (n_head, 1, head_size), jnp.float32, -lim_h, lim_h)
    wk = jax.random.uniform(ks[2], (n_head, hidden_dim, head_size), jnp.float32, -lim_h, lim_h)
    bk = jax.random.uniform(ks[3], (n_head, 1, head_size), jnp.float32, -lim_h, lim_h)
    wv = jax.random.uniform(ks[4], (n_head, hidden_dim, head_size), jnp.float32, -lim_h, lim_h)
    bv = jax.random.uniform(ks[5], (n_head, 1, head_size), jnp.float32, -lim_h, lim_h)
    wp = jax.random.uniform(ks[6], (hidden_dim, hidden_dim), jnp.float32, -lim_h, lim_h)
    bp = jax.random.uniform(ks[7], (1, hidden_dim), jnp.float32, -lim_h, lim_h)
    return (wq, bq, wk, bk, wv, bv, wp, bp)


def reference(x, params, *, n_head, head_size):
    """Pure-JAX reference mirroring the PyTorch forward (eval mode)."""
    wq, bq, wk, bk, wv, bv, wp, bp = params
    B, S, H = x.shape
    mask = jnp.tril(jnp.ones((S, S), bool))
    outs = []
    for h in range(n_head):
        q = x @ wq[h] + bq[h]
        k = x @ wk[h] + bk[h]
        v = x @ wv[h] + bv[h]
        w = q @ jnp.swapaxes(k, -2, -1)
        w = jnp.where(mask, w, -jnp.inf)
        w = jax.nn.softmax(w, axis=-1) / math.sqrt(head_size)
        outs.append(w @ v)
    cat = jnp.concatenate(outs, axis=-1)
    return cat @ wp + bp


if __name__ == "__main__":
    # config: hidden_dim=32, n_head=4, head_size=8, block_size=seq=8, dropout=0.0
    B, S, H = 2, 8, 32
    n_head, head_size = 4, 8

    key = jax.random.PRNGKey(0)
    kx, kp = jax.random.split(key)
    x = jax.random.normal(kx, (B, S, H), jnp.float32)
    params = init_params(kp, H, n_head, head_size)

    out = multi_head_attention(x, params, n_head=n_head, head_size=head_size)
    out = jax.block_until_ready(out)

    ref = reference(x, params, n_head=n_head, head_size=head_size)
    assert out.shape == (B, S, H)
    # 1e-3 tolerance: pl.reciprocal(approx=True) sits on the output path.
    # (approx=False in mha_kernel restores 1e-4-exact agreement.)
    assert jnp.allclose(out, ref, atol=1e-3, rtol=1e-3), "mismatch vs reference"

    print("KERNEL_OK")
</pallas_src>

<mosaic_0001>
module attributes {stable_mosaic.version = 11 : i64} {
  func.func @mha_kernel(%arg0: i32, %arg1: memref<16x32xf32, #tpu.memory_space<vmem>>, %arg2: memref<32x96xf32, #tpu.memory_space<vmem>>, %arg3: memref<1x96xf32, #tpu.memory_space<vmem>>, %arg4: memref<32x32xf32, #tpu.memory_space<vmem>>, %arg5: memref<1x32xf32, #tpu.memory_space<vmem>>, %arg6: memref<16x32xf32, #tpu.memory_space<vmem>>) attributes {dimension_semantics = [#tpu.dimension_semantics<arbitrary>], iteration_bounds = array<i64: 1>, scalar_prefetch = 0 : i64, scratch_operands = 0 : i64, tpu.core_type = #tpu.core_type<tc>, window_params = [{pipeline_mode = #tpu.pipeline_mode<synchronous>, transform_indices = @transform_0, window_bounds = array<i64: 16, 32>}, {pipeline_mode = #tpu.pipeline_mode<synchronous>, transform_indices = @transform_1, window_bounds = array<i64: 32, 96>}, {pipeline_mode = #tpu.pipeline_mode<synchronous>, transform_indices = @transform_2, window_bounds = array<i64: 1, 96>}, {pipeline_mode = #tpu.pipeline_mode<synchronous>, transform_indices = @transform_3, window_bounds = array<i64: 32, 32>}, {pipeline_mode = #tpu.pipeline_mode<synchronous>, transform_indices = @transform_4, window_bounds = array<i64: 1, 32>}, {pipeline_mode = #tpu.pipeline_mode<synchronous>, transform_indices = @transform_5, window_bounds = array<i64: 16, 32>}]} {
    %c0 = arith.constant 0 : index
    %c0_0 = arith.constant 0 : index
    %0 = vector.load %arg1[%c0, %c0_0] : memref<16x32xf32, #tpu.memory_space<vmem>>, vector<16x32xf32>
    %c0_1 = arith.constant 0 : index
    %c0_2 = arith.constant 0 : index
    %1 = vector.load %arg2[%c0_1, %c0_2] : memref<32x96xf32, #tpu.memory_space<vmem>>, vector<32x96xf32>
    %cst = arith.constant dense<0.000000e+00> : vector<16x96xf32>
    %2 = tpu.matmul %0, %1, %cst {dimension_numbers = #tpu.dot_dimension_numbers<[1], [0], [0], [1], [0, 0, 1, 1], [], []>} : vector<16x32xf32>, vector<32x96xf32>, vector<16x96xf32> -> vector<16x96xf32>
    %c0_3 = arith.constant 0 : index
    %c0_4 = arith.constant 0 : index
    %3 = vector.load %arg3[%c0_3, %c0_4] : memref<1x96xf32, #tpu.memory_space<vmem>>, vector<1x96xf32>
    %4 = vector.broadcast %3 : vector<1x96xf32> to vector<16x96xf32>
    %5 = arith.addf %2, %4 : vector<16x96xf32>
    %6 = tpu.iota {dimensions = array<i32: 0>} : vector<8x8xi32>
    %7 = tpu.iota {dimensions = array<i32: 1>} : vector<8x8xi32>
    %8 = arith.cmpi sle, %7, %6 : vector<8x8xi32>
    %cst_5 = arith.constant 0.000000e+00 : f32
    %cst_6 = arith.constant -1.000000e+30 : f32
    %9 = vector.broadcast %cst_5 : f32 to vector<8x8xf32>
    %10 = vector.broadcast %cst_6 : f32 to vector<8x8xf32>
    %11 = arith.select %8, %9, %10 : vector<8x8xi1>, vector<8x8xf32>
    %c0_7 = arith.constant 0 : index
    %c0_8 = arith.constant 0 : index
    %12 = vector.load %arg4[%c0_7, %c0_8] : memref<32x32xf32, #tpu.memory_space<vmem>>, vector<32x32xf32>
    %c0_9 = arith.constant 0 : index
    %c0_10 = arith.constant 0 : index
    %13 = vector.load %arg5[%c0_9, %c0_10] : memref<1x32xf32, #tpu.memory_space<vmem>>, vector<1x32xf32>
    %14 = vector.extract_strided_slice %5 {offsets = [0, 0], sizes = [8, 96], strides = [1, 1]} : vector<16x96xf32> to vector<8x96xf32>
    %cst_11 = arith.constant 0.000000e+00 : f32
    %15 = vector.broadcast %cst_11 : f32 to vector<8x32xf32>
    %16 = vector.extract_strided_slice %14 {offsets = [0, 0], sizes = [8, 8], strides = [1, 1]} : vector<8x96xf32> to vector<8x8xf32>
    %17 = vector.extract_strided_slice %14 {offsets = [0, 32], sizes = [8, 8], strides = [1, 1]} : vector<8x96xf32> to vector<8x8xf32>
    %18 = vector.extract_strided_slice %14 {offsets = [0, 64], sizes = [8, 8], strides = [1, 1]} : vector<8x96xf32> to vector<8x8xf32>
    %cst_12 = arith.constant dense<0.000000e+00> : vector<8x8xf32>
    %19 = tpu.matmul %16, %17, %cst_12 {dimension_numbers = #tpu.dot_dimension_numbers<[1], [1], [0], [0], [0, 0, 1, 0], [], []>} : vector<8x8xf32>, vector<8x8xf32>, vector<8x8xf32> -> vector<8x8xf32>
    %20 = arith.addf %19, %11 : vector<8x8xf32>
    %cst_13 = arith.constant dense<0xFF800000> : vector<8xf32>
    %21 = vector.multi_reduction <maximumf>, %20, %cst_13 [1] : vector<8x8xf32> to vector<8xf32>
    %22 = vector.shape_cast %21 : vector<8xf32> to vector<8x1xf32>
    %23 = vector.broadcast %22 : vector<8x1xf32> to vector<8x8xf32>
    %24 = arith.subf %20, %23 : vector<8x8xf32>
    %25 = math.exp %24 : vector<8x8xf32>
    %cst_14 = arith.constant dense<0.000000e+00> : vector<8xf32>
    %26 = vector.multi_reduction <add>, %25, %cst_14 [1] : vector<8x8xf32> to vector<8xf32>
    %27 = vector.shape_cast %26 : vector<8xf32> to vector<8x1xf32>
    %28 = tpu.reciprocal %27 {approx = true} : vector<8x1xf32> -> vector<8x1xf32>
    %29 = vector.broadcast %28 : vector<8x1xf32> to vector<8x8xf32>
    %30 = arith.mulf %25, %29 : vector<8x8xf32>
    %cst_15 = arith.constant dense<0.000000e+00> : vector<8x8xf32>
    %31 = tpu.matmul %30, %18, %cst_15 {dimension_numbers = #tpu.dot_dimension_numbers<[1], [0], [0], [1], [0, 0, 1, 1], [], []>} : vector<8x8xf32>, vector<8x8xf32>, vector<8x8xf32> -> vector<8x8xf32>
    %32 = vector.extract_strided_slice %12 {offsets = [0, 0], sizes = [8, 32], strides = [1, 1]} : vector<32x32xf32> to vector<8x32xf32>
    %cst_16 = arith.constant dense<0.000000e+00> : vector<8x32xf32>
    %33 = tpu.matmul %31, %32, %cst_16 {dimension_numbers = #tpu.dot_dimension_numbers<[1], [0], [0], [1], [0, 0, 1, 1], [], []>} : vector<8x8xf32>, vector<8x32xf32>, vector<8x32xf32> -> vector<8x32xf32>
    %34 = arith.addf %15, %33 : vector<8x32xf32>
    %35 = vector.extract_strided_slice %14 {offsets = [0, 8], sizes = [8, 8], strides = [1, 1]} : vector<8x96xf32> to vector<8x8xf32>
    %36 = vector.extract_strided_slice %14 {offsets = [0, 40], sizes = [8, 8], strides = [1, 1]} : vector<8x96xf32> to vector<8x8xf32>
    %37 = vector.extract_strided_slice %14 {offsets = [0, 72], sizes = [8, 8], strides = [1, 1]} : vector<8x96xf32> to vector<8x8xf32>
    %cst_17 = arith.constant dense<0.000000e+00> : vector<8x8xf32>
    %38 = tpu.matmul %35, %36, %cst_17 {dimension_numbers = #tpu.dot_dimension_numbers<[1], [1], [0], [0], [0, 0, 1, 0], [], []>} : vector<8x8xf32>, vector<8x8xf32>, vector<8x8xf32> -> vector<8x8xf32>
    %39 = arith.addf %38, %11 : vector<8x8xf32>
    %cst_18 = arith.constant dense<0xFF800000> : vector<8xf32>
    %40 = vector.multi_reduction <maximumf>, %39, %cst_18 [1] : vector<8x8xf32> to vector<8xf32>
    %41 = vector.shape_cast %40 : vector<8xf32> to vector<8x1xf32>
    %42 = vector.broadcast %41 : vector<8x1xf32> to vector<8x8xf32>
    %43 = arith.subf %39, %42 : vector<8x8xf32>
    %44 = math.exp %43 : vector<8x8xf32>
    %cst_19 = arith.constant dense<0.000000e+00> : vector<8xf32>
    %45 = vector.multi_reduction <add>, %44, %cst_19 [1] : vector<8x8xf32> to vector<8xf32>
    %46 = vector.shape_cast %45 : vector<8xf32> to vector<8x1xf32>
    %47 = tpu.reciprocal %46 {approx = true} : vector<8x1xf32> -> vector<8x1xf32>
    %48 = vector.broadcast %47 : vector<8x1xf32> to vector<8x8xf32>
    %49 = arith.mulf %44, %48 : vector<8x8xf32>
    %cst_20 = arith.constant dense<0.000000e+00> : vector<8x8xf32>
    %50 = tpu.matmul %49, %37, %cst_20 {dimension_numbers = #tpu.dot_dimension_numbers<[1], [0], [0], [1], [0, 0, 1, 1], [], []>} : vector<8x8xf32>, vector<8x8xf32>, vector<8x8xf32> -> vector<8x8xf32>
    %51 = vector.extract_strided_slice %12 {offsets = [8, 0], sizes = [8, 32], strides = [1, 1]} : vector<32x32xf32> to vector<8x32xf32>
    %cst_21 = arith.constant dense<0.000000e+00> : vector<8x32xf32>
    %52 = tpu.matmul %50, %51, %cst_21 {dimension_numbers = #tpu.dot_dimension_numbers<[1], [0], [0], [1], [0, 0, 1, 1], [], []>} : vector<8x8xf32>, vector<8x32xf32>, vector<8x32xf32> -> vector<8x32xf32>
    %53 = arith.addf %34, %52 : vector<8x32xf32>
    %54 = vector.extract_strided_slice %14 {offsets = [0, 16], sizes = [8, 8], strides = [1, 1]} : vector<8x96xf32> to vector<8x8xf32>
    %55 = vector.extract_strided_slice %14 {offsets = [0, 48], sizes = [8, 8], strides = [1, 1]} : vector<8x96xf32> to vector<8x8xf32>
    %56 = vector.extract_strided_slice %14 {offsets = [0, 80], sizes = [8, 8], strides = [1, 1]} : vector<8x96xf32> to vector<8x8xf32>
    %cst_22 = arith.constant dense<0.000000e+00> : vector<8x8xf32>
    %57 = tpu.matmul %54, %55, %cst_22 {dimension_numbers = #tpu.dot_dimension_numbers<[1], [1], [0], [0], [0, 0, 1, 0], [], []>} : vector<8x8xf32>, vector<8x8xf32>, vector<8x8xf32> -> vector<8x8xf32>
    %58 = arith.addf %57, %11 : vector<8x8xf32>
    %cst_23 = arith.constant dense<0xFF800000> : vector<8xf32>
    %59 = vector.multi_reduction <maximumf>, %58, %cst_23 [1] : vector<8x8xf32> to vector<8xf32>
    %60 = vector.shape_cast %59 : vector<8xf32> to vector<8x1xf32>
    %61 = vector.broadcast %60 : vector<8x1xf32> to vector<8x8xf32>
    %62 = arith.subf %58, %61 : vector<8x8xf32>
    %63 = math.exp %62 : vector<8x8xf32>
    %cst_24 = arith.constant dense<0.000000e+00> : vector<8xf32>
    %64 = vector.multi_reduction <add>, %63, %cst_24 [1] : vector<8x8xf32> to vector<8xf32>
    %65 = vector.shape_cast %64 : vector<8xf32> to vector<8x1xf32>
    %66 = tpu.reciprocal %65 {approx = true} : vector<8x1xf32> -> vector<8x1xf32>
    %67 = vector.broadcast %66 : vector<8x1xf32> to vector<8x8xf32>
    %68 = arith.mulf %63, %67 : vector<8x8xf32>
    %cst_25 = arith.constant dense<0.000000e+00> : vector<8x8xf32>
    %69 = tpu.matmul %68, %56, %cst_25 {dimension_numbers = #tpu.dot_dimension_numbers<[1], [0], [0], [1], [0, 0, 1, 1], [], []>} : vector<8x8xf32>, vector<8x8xf32>, vector<8x8xf32> -> vector<8x8xf32>
    %70 = vector.extract_strided_slice %12 {offsets = [16, 0], sizes = [8, 32], strides = [1, 1]} : vector<32x32xf32> to vector<8x32xf32>
    %cst_26 = arith.constant dense<0.000000e+00> : vector<8x32xf32>
    %71 = tpu.matmul %69, %70, %cst_26 {dimension_numbers = #tpu.dot_dimension_numbers<[1], [0], [0], [1], [0, 0, 1, 1], [], []>} : vector<8x8xf32>, vector<8x32xf32>, vector<8x32xf32> -> vector<8x32xf32>
    %72 = arith.addf %53, %71 : vector<8x32xf32>
    %73 = vector.extract_strided_slice %14 {offsets = [0, 24], sizes = [8, 8], strides = [1, 1]} : vector<8x96xf32> to vector<8x8xf32>
    %74 = vector.extract_strided_slice %14 {offsets = [0, 56], sizes = [8, 8], strides = [1, 1]} : vector<8x96xf32> to vector<8x8xf32>
    %75 = vector.extract_strided_slice %14 {offsets = [0, 88], sizes = [8, 8], strides = [1, 1]} : vector<8x96xf32> to vector<8x8xf32>
    %cst_27 = arith.constant dense<0.000000e+00> : vector<8x8xf32>
    %76 = tpu.matmul %73, %74, %cst_27 {dimension_numbers = #tpu.dot_dimension_numbers<[1], [1], [0], [0], [0, 0, 1, 0], [], []>} : vector<8x8xf32>, vector<8x8xf32>, vector<8x8xf32> -> vector<8x8xf32>
    %77 = arith.addf %76, %11 : vector<8x8xf32>
    %cst_28 = arith.constant dense<0xFF800000> : vector<8xf32>
    %78 = vector.multi_reduction <maximumf>, %77, %cst_28 [1] : vector<8x8xf32> to vector<8xf32>
    %79 = vector.shape_cast %78 : vector<8xf32> to vector<8x1xf32>
    %80 = vector.broadcast %79 : vector<8x1xf32> to vector<8x8xf32>
    %81 = arith.subf %77, %80 : vector<8x8xf32>
    %82 = math.exp %81 : vector<8x8xf32>
    %cst_29 = arith.constant dense<0.000000e+00> : vector<8xf32>
    %83 = vector.multi_reduction <add>, %82, %cst_29 [1] : vector<8x8xf32> to vector<8xf32>
    %84 = vector.shape_cast %83 : vector<8xf32> to vector<8x1xf32>
    %85 = tpu.reciprocal %84 {approx = true} : vector<8x1xf32> -> vector<8x1xf32>
    %86 = vector.broadcast %85 : vector<8x1xf32> to vector<8x8xf32>
    %87 = arith.mulf %82, %86 : vector<8x8xf32>
    %cst_30 = arith.constant dense<0.000000e+00> : vector<8x8xf32>
    %88 = tpu.matmul %87, %75, %cst_30 {dimension_numbers = #tpu.dot_dimension_numbers<[1], [0], [0], [1], [0, 0, 1, 1], [], []>} : vector<8x8xf32>, vector<8x8xf32>, vector<8x8xf32> -> vector<8x8xf32>
    %89 = vector.extract_strided_slice %12 {offsets = [24, 0], sizes = [8, 32], strides = [1, 1]} : vector<32x32xf32> to vector<8x32xf32>
    %cst_31 = arith.constant dense<0.000000e+00> : vector<8x32xf32>
    %90 = tpu.matmul %88, %89, %cst_31 {dimension_numbers = #tpu.dot_dimension_numbers<[1], [0], [0], [1], [0, 0, 1, 1], [], []>} : vector<8x8xf32>, vector<8x32xf32>, vector<8x32xf32> -> vector<8x32xf32>
    %91 = arith.addf %72, %90 : vector<8x32xf32>
    %92 = vector.broadcast %13 : vector<1x32xf32> to vector<8x32xf32>
    %93 = arith.addf %91, %92 : vector<8x32xf32>
    %c0_32 = arith.constant 0 : index
    %c0_33 = arith.constant 0 : index
    %94 = vector.load %arg6[%c0_32, %c0_33] : memref<16x32xf32, #tpu.memory_space<vmem>>, vector<8x32xf32>
    tpu.vector_store %arg6[%c0_32, %c0_33], %93 {strides = array<i32>} : memref<16x32xf32, #tpu.memory_space<vmem>>, vector<8x32xf32>,
    %95 = vector.extract_strided_slice %5 {offsets = [8, 0], sizes = [8, 96], strides = [1, 1]} : vector<16x96xf32> to vector<8x96xf32>
    %cst_34 = arith.constant 0.000000e+00 : f32
    %96 = vector.broadcast %cst_34 : f32 to vector<8x32xf32>
    %97 = vector.extract_strided_slice %95 {offsets = [0, 0], sizes = [8, 8], strides = [1, 1]} : vector<8x96xf32> to vector<8x8xf32>
    %98 = vector.extract_strided_slice %95 {offsets = [0, 32], sizes = [8, 8], strides = [1, 1]} : vector<8x96xf32> to vector<8x8xf32>
    %99 = vector.extract_strided_slice %95 {offsets = [0, 64], sizes = [8, 8], strides = [1, 1]} : vector<8x96xf32> to vector<8x8xf32>
    %cst_35 = arith.constant dense<0.000000e+00> : vector<8x8xf32>
    %100 = tpu.matmul %97, %98, %cst_35 {dimension_numbers = #tpu.dot_dimension_numbers<[1], [1], [0], [0], [0, 0, 1, 0], [], []>} : vector<8x8xf32>, vector<8x8xf32>, vector<8x8xf32> -> vector<8x8xf32>
    %101 = arith.addf %100, %11 : vector<8x8xf32>
    %cst_36 = arith.constant dense<0xFF800000> : vector<8xf32>
    %102 = vector.multi_reduction <maximumf>, %101, %cst_36 [1] : vector<8x8xf32> to vector<8xf32>
    %103 = vector.shape_cast %102 : vector<8xf32> to vector<8x1xf32>
    %104 = vector.broadcast %103 : vector<8x1xf32> to vector<8x8xf32>
    %105 = arith.subf %101, %104 : vector<8x8xf32>
    %106 = math.exp %105 : vector<8x8xf32>
    %cst_37 = arith.constant dense<0.000000e+00> : vector<8xf32>
    %107 = vector.multi_reduction <add>, %106, %cst_37 [1] : vector<8x8xf32> to vector<8xf32>
    %108 = vector.shape_cast %107 : vector<8xf32> to vector<8x1xf32>
    %109 = tpu.reciprocal %108 {approx = true} : vector<8x1xf32> -> vector<8x1xf32>
    %110 = vector.broadcast %109 : vector<8x1xf32> to vector<8x8xf32>
    %111 = arith.mulf %106, %110 : vector<8x8xf32>
    %cst_38 = arith.constant dense<0.000000e+00> : vector<8x8xf32>
    %112 = tpu.matmul %111, %99, %cst_38 {dimension_numbers = #tpu.dot_dimension_numbers<[1], [0], [0], [1], [0, 0, 1, 1], [], []>} : vector<8x8xf32>, vector<8x8xf32>, vector<8x8xf32> -> vector<8x8xf32>
    %113 = vector.extract_strided_slice %12 {offsets = [0, 0], sizes = [8, 32], strides = [1, 1]} : vector<32x32xf32> to vector<8x32xf32>
    %cst_39 = arith.constant dense<0.000000e+00> : vector<8x32xf32>
    %114 = tpu.matmul %112, %113, %cst_39 {dimension_numbers = #tpu.dot_dimension_numbers<[1], [0], [0], [1], [0, 0, 1, 1], [], []>} : vector<8x8xf32>, vector<8x32xf32>, vector<8x32xf32> -> vector<8x32xf32>
    %115 = arith.addf %96, %114 : vector<8x32xf32>
    %116 = vector.extract_strided_slice %95 {offsets = [0, 8], sizes = [8, 8], strides = [1, 1]} : vector<8x96xf32> to vector<8x8xf32>
    %117 = vector.extract_strided_slice %95 {offsets = [0, 40], sizes = [8, 8], strides = [1, 1]} : vector<8x96xf32> to vector<8x8xf32>
    %118 = vector.extract_strided_slice %95 {offsets = [0, 72], sizes = [8, 8], strides = [1, 1]} : vector<8x96xf32> to vector<8x8xf32>
    %cst_40 = arith.constant dense<0.000000e+00> : vector<8x8xf32>
    %119 = tpu.matmul %116, %117, %cst_40 {dimension_numbers = #tpu.dot_dimension_numbers<[1], [1], [0], [0], [0, 0, 1, 0], [], []>} : vector<8x8xf32>, vector<8x8xf32>, vector<8x8xf32> -> vector<8x8xf32>
    %120 = arith.addf %119, %11 : vector<8x8xf32>
    %cst_41 = arith.constant dense<0xFF800000> : vector<8xf32>
    %121 = vector.multi_reduction <maximumf>, %120, %cst_41 [1] : vector<8x8xf32> to vector<8xf32>
    %122 = vector.shape_cast %121 : vector<8xf32> to vector<8x1xf32>
    %123 = vector.broadcast %122 : vector<8x1xf32> to vector<8x8xf32>
    %124 = arith.subf %120, %123 : vector<8x8xf32>
    %125 = math.exp %124 : vector<8x8xf32>
    %cst_42 = arith.constant dense<0.000000e+00> : vector<8xf32>
    %126 = vector.multi_reduction <add>, %125, %cst_42 [1] : vector<8x8xf32> to vector<8xf32>
    %127 = vector.shape_cast %126 : vector<8xf32> to vector<8x1xf32>
    %128 = tpu.reciprocal %127 {approx = true} : vector<8x1xf32> -> vector<8x1xf32>
    %129 = vector.broadcast %128 : vector<8x1xf32> to vector<8x8xf32>
    %130 = arith.mulf %125, %129 : vector<8x8xf32>
    %cst_43 = arith.constant dense<0.000000e+00> : vector<8x8xf32>
    %131 = tpu.matmul %130, %118, %cst_43 {dimension_numbers = #tpu.dot_dimension_numbers<[1], [0], [0], [1], [0, 0, 1, 1], [], []>} : vector<8x8xf32>, vector<8x8xf32>, vector<8x8xf32> -> vector<8x8xf32>
    %132 = vector.extract_strided_slice %12 {offsets = [8, 0], sizes = [8, 32], strides = [1, 1]} : vector<32x32xf32> to vector<8x32xf32>
    %cst_44 = arith.constant dense<0.000000e+00> : vector<8x32xf32>
    %133 = tpu.matmul %131, %132, %cst_44 {dimension_numbers = #tpu.dot_dimension_numbers<[1], [0], [0], [1], [0, 0, 1, 1], [], []>} : vector<8x8xf32>, vector<8x32xf32>, vector<8x32xf32> -> vector<8x32xf32>
    %134 = arith.addf %115, %133 : vector<8x32xf32>
    %135 = vector.extract_strided_slice %95 {offsets = [0, 16], sizes = [8, 8], strides = [1, 1]} : vector<8x96xf32> to vector<8x8xf32>
    %136 = vector.extract_strided_slice %95 {offsets = [0, 48], sizes = [8, 8], strides = [1, 1]} : vector<8x96xf32> to vector<8x8xf32>
    %137 = vector.extract_strided_slice %95 {offsets = [0, 80], sizes = [8, 8], strides = [1, 1]} : vector<8x96xf32> to vector<8x8xf32>
    %cst_45 = arith.constant dense<0.000000e+00> : vector<8x8xf32>
    %138 = tpu.matmul %135, %136, %cst_45 {dimension_numbers = #tpu.dot_dimension_numbers<[1], [1], [0], [0], [0, 0, 1, 0], [], []>} : vector<8x8xf32>, vector<8x8xf32>, vector<8x8xf32> -> vector<8x8xf32>
    %139 = arith.addf %138, %11 : vector<8x8xf32>
    %cst_46 = arith.constant dense<0xFF800000> : vector<8xf32>
    %140 = vector.multi_reduction <maximumf>, %139, %cst_46 [1] : vector<8x8xf32> to vector<8xf32>
    %141 = vector.shape_cast %140 : vector<8xf32> to vector<8x1xf32>
    %142 = vector.broadcast %141 : vector<8x1xf32> to vector<8x8xf32>
    %143 = arith.subf %139, %142 : vector<8x8xf32>
    %144 = math.exp %143 : vector<8x8xf32>
    %cst_47 = arith.constant dense<0.000000e+00> : vector<8xf32>
    %145 = vector.multi_reduction <add>, %144, %cst_47 [1] : vector<8x8xf32> to vector<8xf32>
    %146 = vector.shape_cast %145 : vector<8xf32> to vector<8x1xf32>
    %147 = tpu.reciprocal %146 {approx = true} : vector<8x1xf32> -> vector<8x1xf32>
    %148 = vector.broadcast %147 : vector<8x1xf32> to vector<8x8xf32>
    %149 = arith.mulf %144, %148 : vector<8x8xf32>
    %cst_48 = arith.constant dense<0.000000e+00> : vector<8x8xf32>
    %150 = tpu.matmul %149, %137, %cst_48 {dimension_numbers = #tpu.dot_dimension_numbers<[1], [0], [0], [1], [0, 0, 1, 1], [], []>} : vector<8x8xf32>, vector<8x8xf32>, vector<8x8xf32> -> vector<8x8xf32>
    %151 = vector.extract_strided_slice %12 {offsets = [16, 0], sizes = [8, 32], strides = [1, 1]} : vector<32x32xf32> to vector<8x32xf32>
    %cst_49 = arith.constant dense<0.000000e+00> : vector<8x32xf32>
    %152 = tpu.matmul %150, %151, %cst_49 {dimension_numbers = #tpu.dot_dimension_numbers<[1], [0], [0], [1], [0, 0, 1, 1], [], []>} : vector<8x8xf32>, vector<8x32xf32>, vector<8x32xf32> -> vector<8x32xf32>
    %153 = arith.addf %134, %152 : vector<8x32xf32>
    %154 = vector.extract_strided_slice %95 {offsets = [0, 24], sizes = [8, 8], strides = [1, 1]} : vector<8x96xf32> to vector<8x8xf32>
    %155 = vector.extract_strided_slice %95 {offsets = [0, 56], sizes = [8, 8], strides = [1, 1]} : vector<8x96xf32> to vector<8x8xf32>
    %156 = vector.extract_strided_slice %95 {offsets = [0, 88], sizes = [8, 8], strides = [1, 1]} : vector<8x96xf32> to vector<8x8xf32>
    %cst_50 = arith.constant dense<0.000000e+00> : vector<8x8xf32>
    %157 = tpu.matmul %154, %155, %cst_50 {dimension_numbers = #tpu.dot_dimension_numbers<[1], [1], [0], [0], [0, 0, 1, 0], [], []>} : vector<8x8xf32>, vector<8x8xf32>, vector<8x8xf32> -> vector<8x8xf32>
    %158 = arith.addf %157, %11 : vector<8x8xf32>
    %cst_51 = arith.constant dense<0xFF800000> : vector<8xf32>
    %159 = vector.multi_reduction <maximumf>, %158, %cst_51 [1] : vector<8x8xf32> to vector<8xf32>
    %160 = vector.shape_cast %159 : vector<8xf32> to vector<8x1xf32>
    %161 = vector.broadcast %160 : vector<8x1xf32> to vector<8x8xf32>
    %162 = arith.subf %158, %161 : vector<8x8xf32>
    %163 = math.exp %162 : vector<8x8xf32>
    %cst_52 = arith.constant dense<0.000000e+00> : vector<8xf32>
    %164 = vector.multi_reduction <add>, %163, %cst_52 [1] : vector<8x8xf32> to vector<8xf32>
    %165 = vector.shape_cast %164 : vector<8xf32> to vector<8x1xf32>
    %166 = tpu.reciprocal %165 {approx = true} : vector<8x1xf32> -> vector<8x1xf32>
    %167 = vector.broadcast %166 : vector<8x1xf32> to vector<8x8xf32>
    %168 = arith.mulf %163, %167 : vector<8x8xf32>
    %cst_53 = arith.constant dense<0.000000e+00> : vector<8x8xf32>
    %169 = tpu.matmul %168, %156, %cst_53 {dimension_numbers = #tpu.dot_dimension_numbers<[1], [0], [0], [1], [0, 0, 1, 1], [], []>} : vector<8x8xf32>, vector<8x8xf32>, vector<8x8xf32> -> vector<8x8xf32>
    %170 = vector.extract_strided_slice %12 {offsets = [24, 0], sizes = [8, 32], strides = [1, 1]} : vector<32x32xf32> to vector<8x32xf32>
    %cst_54 = arith.constant dense<0.000000e+00> : vector<8x32xf32>
    %171 = tpu.matmul %169, %170, %cst_54 {dimension_numbers = #tpu.dot_dimension_numbers<[1], [0], [0], [1], [0, 0, 1, 1], [], []>} : vector<8x8xf32>, vector<8x32xf32>, vector<8x32xf32> -> vector<8x32xf32>
    %172 = arith.addf %153, %171 : vector<8x32xf32>
    %173 = vector.broadcast %13 : vector<1x32xf32> to vector<8x32xf32>
    %174 = arith.addf %172, %173 : vector<8x32xf32>
    %c8 = arith.constant 8 : index
    %c0_55 = arith.constant 0 : index
    %175 = vector.load %arg6[%c8, %c0_55] : memref<16x32xf32, #tpu.memory_space<vmem>>, vector<8x32xf32>
    tpu.vector_store %arg6[%c8, %c0_55], %174 {strides = array<i32>} : memref<16x32xf32, #tpu.memory_space<vmem>>, vector<8x32xf32>,
    return
  }
  func.func @transform_0(%arg0: i32) -> (i32, i32) {
    %c0_i32 = arith.constant 0 : i32
    %c0_i32_0 = arith.constant 0 : i32
    %c0_i32_1 = arith.constant 0 : i32
    return %c0_i32, %c0_i32_0 : i32, i32
  }
  func.func @transform_1(%arg0: i32) -> (i32, i32) {
    %c0_i32 = arith.constant 0 : i32
    %c0_i32_0 = arith.constant 0 : i32
    %c0_i32_1 = arith.constant 0 : i32
    return %c0_i32, %c0_i32_0 : i32, i32
  }
  func.func @transform_2(%arg0: i32) -> (i32, i32) {
    %c0_i32 = arith.constant 0 : i32
    %c0_i32_0 = arith.constant 0 : i32
    %c0_i32_1 = arith.constant 0 : i32
    return %c0_i32, %c0_i32_0 : i32, i32
  }
  func.func @transform_3(%arg0: i32) -> (i32, i32) {
    %c0_i32 = arith.constant 0 : i32
    %c0_i32_0 = arith.constant 0 : i32
    %c0_i32_1 = arith.constant 0 : i32
    return %c0_i32, %c0_i32_0 : i32, i32
  }
  func.func @transform_4(%arg0: i32) -> (i32, i32) {
    %c0_i32 = arith.constant 0 : i32
    %c0_i32_0 = arith.constant 0 : i32
    %c0_i32_1 = arith.constant 0 : i32
    return %c0_i32, %c0_i32_0 : i32, i32
  }
  func.func @transform_5(%arg0: i32) -> (i32, i32) {
    %c0_i32 = arith.constant 0 : i32
    %c0_i32_0 = arith.constant 0 : i32
    %c0_i32_1 = arith.constant 0 : i32
    return %c0_i32, %c0_i32_0 : i32, i32
  }
}

</mosaic_0001>

<bundles_post_ra>
// kernel: tpu_custom_call.1
= control target key start
LH: loop header
LB: loop body
LE: loop exit
PB: predicated region body
PF: predicated region fallthrough
CT: control target
= control target key end

     0   :  { %10 = vsyncpa [#allocation3], 0  ;;  %s2808_s0 = inlined_call_operand.hbm [shape: f32[16,32], index: 0, kind: input, shape index: {}]   ;;  %s2809_s1 = inlined_call_operand.hbm [shape: f32[32,96], index: 1, kind: input, shape index: {}]   ;;  %s2810_s2 = inlined_call_operand.vmem [shape: f32[1,96], index: 2, kind: input, shape index: {}]   ;;  %s2811_s3 = inlined_call_operand.hbm [shape: f32[32,32], index: 3, kind: input, shape index: {}]   ;;  %s2812_s4 = inlined_call_operand.vmem [shape: f32[1,32], index: 4, kind: input, shape index: {}]   ;;  %s2813_s5 = inlined_call_operand.hbm [shape: f32[16,32], index: 5, kind: output, shape index: {}]  }
   0x1   :  { %11 = vsyncpa [#allocation6], 0 }
   0x2   :  { %12 = vsyncpa [#allocation4], 0  ;;  %s2478_s18 = smov [#allocation5]   ;;  %s2479_s20 = smov [#allocation2]  }
   0x3   :  { %s30_s19 = sshll.u32 %s2478_s18, 4  ;;  %s18_s21 = sshll.u32 %s2479_s20, 4  ;;  %s31_s19 = int_to_ptr.vmem [resolvable:$true] %s30_s19  ;;  %s2528_s21 = int_to_ptr.vmem [resolvable:$true] %s18_s21 }
   0x4   :  { %s2384_s24 = scalar_lea.hbm %s2809_s1, 512 }
   0x5   :  { %p2385_p0 = scmp.ne.s32.totalorder %s2809_s1, %s2384_s24  ;;  %p2388_p1 = scmp.lt.u32.totalorder %s2384_s24, %s2809_s1 }
   0x7   :  { %p2390_p2 = pnand %p2388_p1, %p2385_p0 }
   0x9   :  { %2393 = shalt.err (!%p2390_p2)
}
   0xa   :  { %s2394_s29 = scalar_lea.vmem %s31_s19, 512  ;;  %p2399_p4 = scmp.lt.s32.totalorder %s31_s19, %s31_s19 }
   0xb   :  { %p2395_p3 = scmp.ne.s32.totalorder %s31_s19, %s2394_s29  ;;  %p2400_p5 = scmp.lt.s32.totalorder %s2394_s29, %s2394_s29 }
   0xd   :  { %p2401_p6 = por %p2400_p5, %p2399_p4 }
   0xf   :  { %p2402_p7 = pnand %p2401_p6, %p2395_p3 }
  0x11   :  { %2405 = shalt.err (!%p2402_p7)
}
  0x12   :  { %s2480_s30 = smov 128   ;;  %s2481_s6 = smov 8  }
  0x13   :  { %36 = dma.hbm_to_vmem [thread:$0]  %s2809_s1, 512, %s31_s19, [#allocation6], %s2480_s30, %s2480_s30, %s2481_s6  }
  0x14   :  { %s2406_s11 = scalar_lea.hbm %s2808_s0, 256 }
  0x15   :  { %p2407_p8 = scmp.ne.s32.totalorder %s2808_s0, %s2406_s11  ;;  %p2410_p9 = scmp.lt.u32.totalorder %s2406_s11, %s2808_s0 }
  0x17   :  { %p2412_p10 = pnand %p2410_p9, %p2407_p8 }
  0x19   :  { %2415 = shalt.err (!%p2412_p10)
}
  0x1a   :  { %s2416_s16 = scalar_lea.vmem %s2528_s21, 256  ;;  %p2421_p12 = scmp.lt.s32.totalorder %s2528_s21, %s2528_s21 }
  0x1b   :  { %p2417_p11 = scmp.ne.s32.totalorder %s2528_s21, %s2416_s16  ;;  %p2422_p13 = scmp.lt.s32.totalorder %s2416_s16, %s2416_s16 }
  0x1d   :  { %p2423_p0 = por %p2422_p13, %p2421_p12 }
  0x1f   :  { %p2424_p1 = pnand %p2423_p0, %p2417_p11 }
  0x21   :  { %2427 = shalt.err (!%p2424_p1)
}
  0x22   :  { %24 = dma.hbm_to_vmem [thread:$0]  %s2808_s0, 256, %s2528_s21, [#allocation3], %s2480_s30, %s2480_s30, %s2481_s6  }
  0x23   :  { %s2482_s18 = smov [#allocation7]   ;;  %s2428_s23 = scalar_lea.hbm %s2811_s3, 512 }
  0x24   :  { %s44_s19 = sshll.u32 %s2482_s18, 4  ;;  %p2429_p2 = scmp.ne.s32.totalorder %s2811_s3, %s2428_s23  ;;  %s45_s19 = int_to_ptr.vmem [resolvable:$true] %s44_s19 }
  0x25   :  { %p2432_p3 = scmp.lt.u32.totalorder %s2428_s23, %s2811_s3 }
  0x27   :  { %p2434_p4 = pnand %p2432_p3, %p2429_p2 }
  0x29   :  { %2437 = shalt.err (!%p2434_p4)
}
  0x2a   :  { %s2438_s28 = scalar_lea.vmem %s45_s19, 512  ;;  %p2443_p6 = scmp.lt.s32.totalorder %s45_s19, %s45_s19 }
  0x2b   :  { %p2439_p5 = scmp.ne.s32.totalorder %s45_s19, %s2438_s28  ;;  %p2444_p7 = scmp.lt.s32.totalorder %s2438_s28, %s2438_s28 }
  0x2d   :  { %p2445_p8 = por %p2444_p7, %p2443_p6 }
  0x2f   :  { %p2446_p9 = pnand %p2445_p8, %p2439_p5 }
  0x31   :  { %2449 = shalt.err (!%p2446_p9)
}
  0x32   :  { %50 = dma.hbm_to_vmem [thread:$0]  %s2811_s3, 512, %s45_s19, [#allocation6], %s2480_s30, %s2480_s30, %s2481_s6  }
  0x33   :  { %2472 = dma.done.wait [#allocation3], 256  }
  0x34   :  { %2473 = vsyncadd [#allocation3], 4294967040 }
  0x35   :  { %2474 = dma.done.wait [#allocation6], 1024  }
  0x36   :  { %2475 = vsyncadd [#allocation6], 4294966272  ;;  %vm75_vm0 = vcmask 261120   ;;  %v64_v0 = vld [vmem:[#allocation5] sm:$0xff]  ;;  %v65_v1 = vld [vmem:[#allocation5 + $0x8] sm:$0xff]  ;;  %v2483_v8 = vmov 0.0   ;;  %v157_v17 = vlaneseq }
  0x37   :  { %v66_v2 = vld [vmem:[#allocation5 + $0x10] sm:$0xff]  ;;  %v2324_v3 = vpack.c.bf16 %v65_v1, %v64_v0  ;;  %v67_v4 = vld [vmem:[#allocation5 + $0x18] sm:$0xff]  ;;  %2204 = vmatprep.subr.mxu1 %v2483_v8  ;;  %vm2484_vm1 = vmmov 0   ;;  %s2485_s7 = smov 120   ;;  %s2486_s8 = smov 96   ;;  %vm171_vm2 = vcmask 64512  }
  0x38   :  { %v62_v5 = vld [vmem:[#allocation2] sm:$0xff]  ;;  %v2328_v6 = vpack.c.bf16 %v67_v4, %v66_v2  ;;  %v63_v7 = vld [vmem:[#allocation2 + $0x8] sm:$0xff]  ;;  %2206 = vmatprep.mubr.msk.f32.mxu1 %vm2484_vm1, %v2483_v8  ;;  %s2487_s9 = smov 88   ;;  %v158_v18 = vshrl.u32 %v157_v17, 7  ;;  %v160_v19 = vand.u32 127, %v157_v17  ;;  %s2490_s10 = smov 64  }
  0x39   :  { %2201 = vmatprep.mubr.msk.f32.mxu0 %vm75_vm0, %v62_v5  ;;  %2325 = vmatprep.subr.bf16.mxu0 %v2324_v3  ;;  %v2103_v9 = vld [vmem:[%s2810_s2] ss:$0 sm:$0xff]  ;;  %v2488_v20 = vmov -1e+30   ;;  %s2489_s2 = smov 56   ;;  %s2491_s11 = smov 80  }
  0x3a   :  { %2327 = vmatpush3.bf16.msra.mxu0 %v2324_v3  ;;  %vm161_vm3 = vcmp.le.s32.totalorder %v160_v19, %v158_v18  ;;  %s2492_s12 = smov 112   ;;  %v2628_v40 = vld [vmem:[#allocation7 + $0x8] sm:$0xff]  ;;  %v2640_v49 = vld [vmem:[#allocation7] sm:$0xff]  ;;  %s2493_s13 = smov 72  }
  0x3b   :  { %2329 = vmatprep.subr.bf16.mxu0 %v2328_v6  ;;  %v2612_v21 = vsel %vm161_vm3, 0.0, %v2488_v20  ;;  %s2494_s14 = smov 104   ;;  %s2495_s15 = smov 48  }
  0x3c   :  { %s2496_s16 = smov 40  }
  0x3e   :  { %2331 = vmatpush3.bf16.msra.mxu0 %v2328_v6 }
  0x3f   :  { %2214 = vmatprep.subr.mxu0 %v2483_v8 }
  0x41   :  { %2202 = vmatmul.mubr.msk.f32.vlgmr.msra.gmra.mrb[0].mxu0 %vm75_vm0, %v63_v7 }
  0x42   :  { %2216 = vmatprep.mubr.msk.f32.mxu0 %vm2484_vm1, %v2483_v8 }
 0x114   :  { %v2203_v10 = vpop.f32.mrb[0].mxu0 }
 0x115   :  { %v2591_v11 = vadd.f32 %v2203_v10, %v2103_v9  ;;  %v148_v12 = vpop.f32.mrb[1].mxu0 }
 0x116   :  { %v2593_v13 = vadd.f32 %v2103_v9, %v148_v12 }
 0x118   :  { %333 = vrot.lane.b32.xlu1 %v2593_v13, %s2485_s7  ;;  %169 = vrot.lane.b32.xlu0 %v2593_v13, %s2486_s8 }
 0x11c   :  { %335 = vrot.lane.b32.xlu0 %v2593_v13, %s2487_s9 }
 0x18a   :  { %v170_v14 = vpop.permute.xlu0 %169  ;;  %v334_v16 = vpop.permute.xlu1 %333 }
 0x18b   :  { %2205 = vmatpush3.xpose.msk.msra.mxu1 %vm171_vm2, %v170_v14 }
 0x18c   :  { %2209 = vmatprep.subr.mxu1 %v2483_v8 }
 0x18e   :  { %2207 = vmatmul.mubr.msk.f32.vlgmr.msra.gmra.mrb[0].mxu1 %vm171_vm2, %v2593_v13  ;;  %v336_v15 = vpop.permute.xlu0 %335 }
 0x18f   :  { %2215 = vmatpush3.xpose.msk.msra.mxu0 %vm171_vm2, %v336_v15  ;;  %2211 = vmatprep.mubr.msk.f32.mxu1 %vm2484_vm1, %v2483_v8  ;;  %v2677_v15 = vld [vmem:[#allocation7 + $0x10] sm:$0xff] }
 0x190   :  { %2224 = vmatprep.subr.mxu0 %v2483_v8 }
 0x192   :  { %2217 = vmatmul.mubr.msk.f32.vlgmr.msra.gmra.mrb[2].mxu0 %vm171_vm2, %v334_v16 }
 0x193   :  { %2226 = vmatprep.mubr.msk.f32.mxu0 %vm2484_vm1, %v2483_v8  ;;  %2225 = vmatpush3.msra.mxu0 %v2628_v40 }
 0x194   :  { %2234 = vmatprep.subr.mxu0 %v2483_v8 }
 0x261   :  { %v242_v22 = vpop.f32.mrb[0].mxu1 }
 0x262   :  { %v243_v23 = vadd.f32 %v242_v22, %v2612_v21  ;;  %v2208_v24 = vpop.f32.mrb[1].mxu1 }
 0x264   :  { %v246_v25 = vsel %vm171_vm2, %v243_v23, -inf }
 0x265   :  { %247 = vmax.xlane.f32.xlu1 %v246_v25  ;;  %v407_v26 = vpop.f32.mrb[2].mxu0 }
 0x266   :  { %v408_v27 = vadd.f32 %v407_v26, %v2612_v21  ;;  %v2218_v28 = vpop.f32.mrb[3].mxu0 }
 0x268   :  { %v411_v29 = vsel %vm171_vm2, %v408_v27, -inf }
 0x269   :  { %412 = vmax.xlane.f32.xlu0 %v411_v29 }
 0x2f2   :  { %v248_v30 = vpop.xlane.xlu1 %247 }
 0x2f3   :  { %v249_v31 = vsub.f32 %v243_v23, %v248_v30 }
 0x2f5   :  { %v250_v32 = vmul.f32 1.442695, %v249_v31 }
 0x2f6   :  { %v413_v33 = vpop.xlane.xlu0 %412 }
 0x2f7   :  { %2352 = vpow2.f32 %v250_v32  ;;  %v414_v34 = vsub.f32 %v408_v27, %v413_v33 }
 0x2f9   :  { %v415_v35 = vmul.f32 1.442695, %v414_v34 }
 0x2fb   :  { %2354 = vpow2.f32 %v415_v35 }
 0x301   :  { %v2353_v36 = vpop.eup %2352 }
 0x302   :  { %v252_v37 = vsel %vm171_vm2, %v2353_v36, 0.0 }
 0x303   :  { %253 = vadd.xlane.f32.xlu0 %v252_v37  ;;  %v2711_v37 = vld [vmem:[#allocation7 + $0x18] sm:$0xff] }
 0x305   :  { %v2355_v38 = vpop.eup %2354 }
 0x306   :  { %v417_v39 = vsel %vm171_vm2, %v2355_v38, 0.0 }
 0x307   :  { %418 = vadd.xlane.f32.xlu1 %v417_v39 }
 0x318   :  { %422 = vrot.lane.b32.xlu1 %v2593_v13, %s2489_s2 }
 0x319   :  { %257 = vrot.lane.b32.xlu0 %v2593_v13, %s2490_s10 }
 0x31c   :  { %646 = vrot.lane.b32.xlu1 %v2593_v13, %s2491_s11 }
 0x31d   :  { %644 = vrot.lane.b32.xlu0 %v2593_v13, %s2492_s12 }
 0x390   :  { %v254_v41 = vpop.xlane.xlu0 %253 }
 0x391   :  { %2356 = vrcp.f32 %v254_v41 }
 0x394   :  { %v419_v42 = vpop.xlane.xlu1 %418  ;;  %v258_v43 = vpop.permute.xlu0 %257 }
 0x395   :  { %2358 = vrcp.f32 %v419_v42  ;;  %2210 = vmatpush3.msra.mxu1 %v258_v43 }
 0x396   :  { %2219 = vmatprep.subr.mxu1 %v2483_v8 }
 0x398   :  { %v423_v46 = vpop.permute.xlu1 %422  ;;  %v645_v55 = vpop.permute.xlu0 %644 }
 0x39b   :  { %v2357_v44 = vpop.eup %2356 }
 0x39c   :  { %v256_v45 = vmul.f32 %v2357_v44, %v2353_v36  ;;  %v647_v53 = vpop.permute.xlu1 %646 }
 0x39e   :  { %2212 = vmatmul.mubr.msk.f32.vlgmr.msra.gmra.mrb[2].mxu1 %vm171_vm2, %v256_v45 }
 0x39f   :  { %v2359_v47 = vpop.eup %2358  ;;  %2220 = vmatpush3.msra.mxu1 %v423_v46  ;;  %2221 = vmatprep.mubr.msk.f32.mxu1 %vm2484_vm1, %v2483_v8 }
 0x3a0   :  { %v421_v48 = vmul.f32 %v2359_v47, %v2355_v38  ;;  %2229 = vmatprep.subr.mxu1 %v2483_v8 }
 0x3a2   :  { %2222 = vmatmul.mubr.msk.f32.vlgmr.msra.gmra.mrb[4].mxu1 %vm171_vm2, %v421_v48 }
 0x3a3   :  { %2231 = vmatprep.mubr.msk.f32.mxu1 %vm2484_vm1, %v2483_v8  ;;  %2230 = vmatpush3.msra.mxu1 %v2640_v49 }
 0x3a4   :  { %2239 = vmatprep.subr.mxu1 %v2483_v8 }
 0x471   :  { %v329_v50 = vpop.f32.mrb[2].mxu1 }
 0x472   :  { %v2213_v51 = vpop.f32.mrb[3].mxu1  ;;  %2232 = vmatmul.mubr.msk.f32.vlgmr.msra.gmra.mrb[6].mxu1 %vm171_vm2, %v329_v50 }
 0x473   :  { %2241 = vmatprep.mubr.msk.f32.mxu1 %vm2484_vm1, %v2483_v8 }
 0x475   :  { %v494_v52 = vpop.f32.mrb[4].mxu1 }
 0x476   :  { %v2223_v54 = vpop.f32.mrb[5].mxu1  ;;  %2227 = vmatmul.mubr.msk.f32.vlgmr.msra.gmra.mrb[4].mxu0 %vm171_vm2, %v494_v52 }
 0x477   :  { %2235 = vmatpush3.xpose.msk.msra.mxu0 %vm171_vm2, %v647_v53  ;;  %2236 = vmatprep.mubr.msk.f32.mxu0 %vm2484_vm1, %v2483_v8 }
 0x478   :  { %2244 = vmatprep.subr.mxu0 %v2483_v8 }
 0x47a   :  { %2237 = vmatmul.mubr.msk.f32.vlgmr.msra.gmra.mrb[6].mxu0 %vm171_vm2, %v645_v55 }
 0x47b   :  { %2246 = vmatprep.mubr.msk.f32.mxu0 %vm2484_vm1, %v2483_v8  ;;  %2245 = vmatpush3.msra.mxu0 %v2677_v15 }
 0x47c   :  { %2254 = vmatprep.subr.mxu0 %v2483_v8 }
 0x545   :  { %v640_v56 = vpop.f32.mrb[6].mxu1 }
 0x546   :  { %v2233_v57 = vpop.f32.mrb[7].mxu1 }
 0x549   :  { %v567_v58 = vpop.f32.mrb[4].mxu0 }
 0x54a   :  { %v2655_v59 = vadd.f32 %v640_v56, %v567_v58  ;;  %v2228_v60 = vpop.f32.mrb[5].mxu0 }
 0x54b   :  { %v2736_v60 = vld [vmem:[%s2812_s4] ss:$0 sm:$0xff]  ;;  %s2497_s4 = smov [#allocation8]  }
 0x54c   :  { %s2090_s18 = sshll.u32 %s2497_s4, 4  ;;  %s2091_s18 = int_to_ptr.vmem [resolvable:$true] %s2090_s18 }
 0x54d   :  { %v718_v61 = vpop.f32.mrb[6].mxu0  ;;  %s2450_s19 = scalar_lea.vmem %s2091_s18, 256  ;;  %p2455_p11 = scmp.lt.s32.totalorder %s2091_s18, %s2091_s18 }
 0x54e   :  { %v719_v62 = vadd.f32 %v718_v61, %v2612_v21  ;;  %v2238_v63 = vpop.f32.mrb[7].mxu0  ;;  %p2451_p10 = scmp.ne.s32.totalorder %s2091_s18, %s2450_s19  ;;  %p2456_p12 = scmp.lt.s32.totalorder %s2450_s19, %s2450_s19 }
 0x550   :  { %v722_v0 = vsel %vm171_vm2, %v719_v62, -inf  ;;  %p2457_p13 = por %p2456_p12, %p2455_p11 }
 0x551   :  { %723 = vmax.xlane.f32.xlu1 %v722_v0 }
 0x552   :  { %p2458_p0 = pnand %p2457_p13, %p2451_p10 }
 0x562   :  { %885 = vrot.lane.b32.xlu1 %v2593_v13, %s2493_s13 }
 0x566   :  { %883 = vrot.lane.b32.xlu1 %v2593_v13, %s2494_s14 }
 0x56a   :  { %1131 = vrot.lane.b32.xlu1 %v2591_v11, %s2486_s8 }
 0x5de   :  { %v724_v1 = vpop.xlane.xlu1 %723 }
 0x5df   :  { %v725_v2 = vsub.f32 %v719_v62, %v724_v1 }
 0x5e1   :  { %v726_v3 = vmul.f32 1.442695, %v725_v2 }
 0x5e2   :  { %v886_v10 = vpop.permute.xlu1 %885 }
 0x5e3   :  { %2360 = vpow2.f32 %v726_v3 }
 0x5e6   :  { %v884_v14 = vpop.permute.xlu1 %883 }
 0x5ea   :  { %v1132_v31 = vpop.permute.xlu1 %1131 }
 0x5ed   :  { %v2361_v4 = vpop.eup %2360 }
 0x5ee   :  { %v728_v5 = vsel %vm171_vm2, %v2361_v4, 0.0 }
 0x5ef   :  { %729 = vadd.xlane.f32.xlu0 %v728_v5 }
 0x605   :  { %733 = vrot.lane.b32.xlu0 %v2593_v13, %s2495_s15 }
 0x67c   :  { %v730_v6 = vpop.xlane.xlu0 %729 }
 0x67d   :  { %2362 = vrcp.f32 %v730_v6 }
 0x680   :  { %v734_v7 = vpop.permute.xlu0 %733 }
 0x681   :  { %2240 = vmatpush3.msra.mxu1 %v734_v7 }
 0x682   :  { %2249 = vmatprep.subr.mxu1 %v2483_v8 }
 0x687   :  { %v2363_v9 = vpop.eup %2362 }
 0x688   :  { %v732_v12 = vmul.f32 %v2363_v9, %v2361_v4 }
 0x68a   :  { %2242 = vmatmul.mubr.msk.f32.vlgmr.msra.gmra.mrb[8].mxu1 %vm171_vm2, %v732_v12 }
 0x68b   :  { %2250 = vmatpush3.xpose.msk.msra.mxu1 %vm171_vm2, %v886_v10  ;;  %2251 = vmatprep.mubr.msk.f32.mxu1 %vm2484_vm1, %v2483_v8 }
 0x68c   :  { %2259 = vmatprep.subr.mxu1 %v2483_v8 }
 0x68e   :  { %2252 = vmatmul.mubr.msk.f32.vlgmr.msra.gmra.mrb[10].mxu1 %vm171_vm2, %v884_v14 }
 0x68f   :  { %2261 = vmatprep.mubr.msk.f32.mxu1 %vm2484_vm1, %v2483_v8  ;;  %2260 = vmatpush3.msra.mxu1 %v2711_v37 }
 0x690   :  { %2269 = vmatprep.subr.mxu1 %v2483_v8 }
 0x75d   :  { %v805_v16 = vpop.f32.mrb[8].mxu1 }
 0x75e   :  { %v2243_v17 = vpop.f32.mrb[9].mxu1  ;;  %2247 = vmatmul.mubr.msk.f32.vlgmr.msra.gmra.mrb[8].mxu0 %vm171_vm2, %v805_v16 }
 0x75f   :  { %2256 = vmatprep.mubr.msk.f32.mxu0 %vm2484_vm1, %v2483_v8 }
 0x761   :  { %v957_v18 = vpop.f32.mrb[10].mxu1 }
 0x762   :  { %v958_v19 = vadd.f32 %v957_v18, %v2612_v21  ;;  %v2253_v20 = vpop.f32.mrb[11].mxu1 }
 0x764   :  { %v961_v22 = vsel %vm171_vm2, %v958_v19, -inf }
 0x765   :  { %962 = vmax.xlane.f32.xlu0 %v961_v22 }
 0x77b   :  { %972 = vrot.lane.b32.xlu0 %v2593_v13, %s2496_s16 }
 0x77f   :  { %1296 = vrot.lane.b32.xlu0 %v2591_v11, %s2487_s9 }
 0x7f2   :  { %v963_v23 = vpop.xlane.xlu0 %962 }
 0x7f3   :  { %v964_v24 = vsub.f32 %v958_v19, %v963_v23 }
 0x7f5   :  { %v965_v25 = vmul.f32 1.442695, %v964_v24 }
 0x7f6   :  { %v973_v26 = vpop.permute.xlu0 %972 }
 0x7f7   :  { %2364 = vpow2.f32 %v965_v25  ;;  %2255 = vmatpush3.msra.mxu0 %v973_v26 }
 0x7f8   :  { %2264 = vmatprep.subr.mxu0 %v2483_v8 }
 0x7fa   :  { %v1297_v35 = vpop.permute.xlu0 %1296 }
 0x801   :  { %v2365_v27 = vpop.eup %2364 }
 0x802   :  { %v967_v28 = vsel %vm171_vm2, %v2365_v27, 0.0 }
 0x803   :  { %968 = vadd.xlane.f32.xlu1 %v967_v28 }
 0x814   :  { %1294 = vrot.lane.b32.xlu1 %v2591_v11, %s2485_s7 }
 0x831   :  { %v878_v29 = vpop.f32.mrb[8].mxu0 }
 0x832   :  { %v882_v13 = vadd.f32 %v878_v29, %v2655_v59  ;;  %v2248_v30 = vpop.f32.mrb[9].mxu0 }
 0x890   :  { %v969_v32 = vpop.xlane.xlu1 %968 }
 0x891   :  { %2366 = vrcp.f32 %v969_v32 }
 0x894   :  { %v1295_v36 = vpop.permute.xlu1 %1294 }
 0x89b   :  { %v2367_v33 = vpop.eup %2366 }
 0x89c   :  { %v971_v34 = vmul.f32 %v2367_v33, %v2365_v27 }
 0x89e   :  { %2257 = vmatmul.mubr.msk.f32.vlgmr.msra.gmra.mrb[10].mxu0 %vm171_vm2, %v971_v34 }
 0x89f   :  { %2265 = vmatpush3.xpose.msk.msra.mxu0 %vm171_vm2, %v1132_v31  ;;  %2266 = vmatprep.mubr.msk.f32.mxu0 %vm2484_vm1, %v2483_v8 }
 0x8a0   :  { %2274 = vmatprep.subr.mxu0 %v2483_v8 }
 0x8a2   :  { %2267 = vmatmul.mubr.msk.f32.vlgmr.msra.gmra.mrb[12].mxu0 %vm171_vm2, %v2591_v11 }
 0x8a3   :  { %2275 = vmatpush3.xpose.msk.msra.mxu0 %vm171_vm2, %v1297_v35  ;;  %2276 = vmatprep.mubr.msk.f32.mxu0 %vm2484_vm1, %v2483_v8 }
 0x8a4   :  { %2284 = vmatprep.subr.mxu0 %v2483_v8 }
 0x8a6   :  { %2277 = vmatmul.mubr.msk.f32.vlgmr.msra.gmra.mrb[14].mxu0 %vm171_vm2, %v1295_v36 }
 0x8a7   :  { %2285 = vmatpush3.msra.mxu0 %v2628_v40  ;;  %2286 = vmatprep.mubr.msk.f32.mxu0 %vm2484_vm1, %v2483_v8 }
 0x8a8   :  { %2294 = vmatprep.subr.mxu0 %v2483_v8 }
 0x971   :  { %v1044_v38 = vpop.f32.mrb[10].mxu0 }
 0x972   :  { %v2258_v39 = vpop.f32.mrb[11].mxu0  ;;  %2262 = vmatmul.mubr.msk.f32.vlgmr.msra.gmra.mrb[12].mxu1 %vm171_vm2, %v1044_v38 }
 0x973   :  { %2271 = vmatprep.mubr.msk.f32.mxu1 %vm2484_vm1, %v2483_v8 }
 0x975   :  { %v1203_v41 = vpop.f32.mrb[12].mxu0 }
 0x976   :  { %v1204_v40 = vadd.f32 %v1203_v41, %v2612_v21  ;;  %v2268_v42 = vpop.f32.mrb[13].mxu0 }
 0x978   :  { %v1207_v43 = vsel %vm171_vm2, %v1204_v40, -inf }
 0x979   :  { %1208 = vmax.xlane.f32.xlu0 %v1207_v43  ;;  %v1368_v44 = vpop.f32.mrb[14].mxu0 }
 0x97a   :  { %v1369_v45 = vadd.f32 %v1368_v44, %v2612_v21  ;;  %v2278_v46 = vpop.f32.mrb[15].mxu0 }
 0x97c   :  { %v1372_v47 = vsel %vm171_vm2, %v1369_v45, -inf }
 0x97d   :  { %1373 = vmax.xlane.f32.xlu1 %v1372_v47 }
 0x98e   :  { %1218 = vrot.lane.b32.xlu1 %v2591_v11, %s2490_s10 }
 0x992   :  { %1607 = vrot.lane.b32.xlu1 %v2591_v11, %s2491_s11 }
 0x996   :  { %1605 = vrot.lane.b32.xlu1 %v2591_v11, %s2492_s12 }
 0xa06   :  { %v1209_v48 = vpop.xlane.xlu0 %1208 }
 0xa07   :  { %v1210_v50 = vsub.f32 %v1204_v40, %v1209_v48 }
 0xa09   :  { %v1211_v51 = vmul.f32 1.442695, %v1210_v50 }
 0xa0a   :  { %v1374_v52 = vpop.xlane.xlu1 %1373 }
 0xa0b   :  { %2368 = vpow2.f32 %v1211_v51  ;;  %v1375_v53 = vsub.f32 %v1369_v45, %v1374_v52 }
 0xa0d   :  { %v1376_v54 = vmul.f32 1.442695, %v1375_v53 }
 0xa0e   :  { %v1219_v55 = vpop.permute.xlu1 %1218 }
 0xa0f   :  { %2370 = vpow2.f32 %v1376_v54  ;;  %2270 = vmatpush3.msra.mxu1 %v1219_v55 }
 0xa10   :  { %2279 = vmatprep.subr.mxu1 %v2483_v8 }
 0xa12   :  { %v1608_v12 = vpop.permute.xlu1 %1607 }
 0xa15   :  { %v2369_v56 = vpop.eup %2368 }
 0xa16   :  { %v1213_v57 = vsel %vm171_vm2, %v2369_v56, 0.0 }
 0xa17   :  { %1214 = vadd.xlane.f32.xlu0 %v1213_v57 }
 0xa19   :  { %v2371_v58 = vpop.eup %2370 }
 0xa1a   :  { %v1378_v59 = vsel %vm171_vm2, %v2371_v58, 0.0 }
 0xa1b   :  { %1379 = vadd.xlane.f32.xlu0 %v1378_v59 }
 0xa31   :  { %1383 = vrot.lane.b32.xlu0 %v2591_v11, %s2489_s2 }
 0xa45   :  { %v1117_v61 = vpop.f32.mrb[12].mxu1 }
 0xa46   :  { %v1121_v62 = vadd.f32 %v1117_v61, %v882_v13  ;;  %v2263_v63 = vpop.f32.mrb[13].mxu1 }
 0xa48   :  { %v1128_v0 = vadd.f32 %v2736_v60, %v1121_v62 }
 0xa4a   :  { %1129 = vst.msk [vmem:[#allocation8] sm:$0xff] %vm75_vm0, %v1128_v0 }
 0xaa4   :  { %v1215_v1 = vpop.xlane.xlu0 %1214 }
 0xaa5   :  { %2372 = vrcp.f32 %v1215_v1 }
 0xaa8   :  { %v1380_v2 = vpop.xlane.xlu0 %1379 }
 0xaa9   :  { %2374 = vrcp.f32 %v1380_v2 }
 0xaac   :  { %v1384_v5 = vpop.permute.xlu0 %1383 }
 0xaaf   :  { %v2373_v3 = vpop.eup %2372 }
 0xab0   :  { %v1217_v4 = vmul.f32 %v2373_v3, %v2369_v56 }
 0xab2   :  { %2272 = vmatmul.mubr.msk.f32.vlgmr.msra.gmra.mrb[14].mxu1 %vm171_vm2, %v1217_v4 }
 0xab3   :  { %v2375_v6 = vpop.eup %2374  ;;  %2280 = vmatpush3.msra.mxu1 %v1384_v5  ;;  %2281 = vmatprep.mubr.msk.f32.mxu1 %vm2484_vm1, %v2483_v8 }
 0xab4   :  { %v1382_v7 = vmul.f32 %v2375_v6, %v2371_v58  ;;  %2289 = vmatprep.subr.mxu1 %v2483_v8 }
 0xab6   :  { %2282 = vmatmul.mubr.msk.f32.vlgmr.msra.gmra.mrb[16].mxu1 %vm171_vm2, %v1382_v7 }
 0xab7   :  { %2290 = vmatpush3.msra.mxu1 %v2640_v49  ;;  %2291 = vmatprep.mubr.msk.f32.mxu1 %vm2484_vm1, %v2483_v8  ;;  %v1606_v49 = vpop.permute.xlu1 %1605 }
 0xab8   :  { %2299 = vmatprep.subr.mxu1 %v2483_v8 }
 0xb85   :  { %v1290_v9 = vpop.f32.mrb[14].mxu1 }
 0xb86   :  { %v2273_v10 = vpop.f32.mrb[15].mxu1  ;;  %2292 = vmatmul.mubr.msk.f32.vlgmr.msra.gmra.mrb[18].mxu1 %vm171_vm2, %v1290_v9 }
 0xb87   :  { %2301 = vmatprep.mubr.msk.f32.mxu1 %vm2484_vm1, %v2483_v8 }
 0xb89   :  { %v1455_v14 = vpop.f32.mrb[16].mxu1 }
 0xb8a   :  { %v2283_v16 = vpop.f32.mrb[17].mxu1  ;;  %2287 = vmatmul.mubr.msk.f32.vlgmr.msra.gmra.mrb[16].mxu0 %vm171_vm2, %v1455_v14 }
 0xb8b   :  { %2295 = vmatpush3.xpose.msk.msra.mxu0 %vm171_vm2, %v1608_v12  ;;  %2296 = vmatprep.mubr.msk.f32.mxu0 %vm2484_vm1, %v2483_v8 }
 0xb8c   :  { %2304 = vmatprep.subr.mxu0 %v2483_v8 }
 0xb8e   :  { %2297 = vmatmul.mubr.msk.f32.vlgmr.msra.gmra.mrb[18].mxu0 %vm171_vm2, %v1606_v49 }
 0xb8f   :  { %2305 = vmatpush3.msra.mxu0 %v2677_v15  ;;  %2306 = vmatprep.mubr.msk.f32.mxu0 %vm2484_vm1, %v2483_v8 }
 0xb90   :  { %2314 = vmatprep.subr.mxu0 %v2483_v8 }
 0xc59   :  { %v1601_v17 = vpop.f32.mrb[18].mxu1 }
 0xc5a   :  { %v2293_v18 = vpop.f32.mrb[19].mxu1 }
 0xc5d   :  { %v1528_v19 = vpop.f32.mrb[16].mxu0 }
 0xc5e   :  { %v1602_v20 = vadd.f32 %v1601_v17, %v1528_v19  ;;  %v2288_v22 = vpop.f32.mrb[17].mxu0 }
 0xc61   :  { %v1679_v23 = vpop.f32.mrb[18].mxu0 }
 0xc62   :  { %v1680_v24 = vadd.f32 %v1679_v23, %v2612_v21  ;;  %v2298_v25 = vpop.f32.mrb[19].mxu0 }
 0xc64   :  { %v1683_v26 = vsel %vm171_vm2, %v1680_v24, -inf }
 0xc65   :  { %1684 = vmax.xlane.f32.xlu0 %v1683_v26 }
 0xc7b   :  { %1694 = vrot.lane.b32.xlu0 %v2591_v11, %s2495_s15 }
 0xc7f   :  { %1844 = vrot.lane.b32.xlu0 %v2591_v11, %s2494_s14 }
 0xcf2   :  { %v1685_v15 = vpop.xlane.xlu0 %1684 }
 0xcf3   :  { %v1686_v27 = vsub.f32 %v1680_v24, %v1685_v15 }
 0xcf5   :  { %v1687_v28 = vmul.f32 1.442695, %v1686_v27 }
 0xcf6   :  { %v1695_v29 = vpop.permute.xlu0 %1694 }
 0xcf7   :  { %2376 = vpow2.f32 %v1687_v28  ;;  %2300 = vmatpush3.msra.mxu1 %v1695_v29 }
 0xcf8   :  { %2309 = vmatprep.subr.mxu1 %v2483_v8 }
 0xcfa   :  { %v1845_v35 = vpop.permute.xlu0 %1844 }
 0xd01   :  { %v2377_v13 = vpop.eup %2376 }
 0xd02   :  { %v1689_v30 = vsel %vm171_vm2, %v2377_v13, 0.0 }
 0xd03   :  { %1690 = vadd.xlane.f32.xlu1 %v1689_v30 }
 0xd14   :  { %1846 = vrot.lane.b32.xlu1 %v2591_v11, %s2493_s13 }
 0xd90   :  { %v1691_v31 = vpop.xlane.xlu1 %1690 }
 0xd91   :  { %2378 = vrcp.f32 %v1691_v31 }
 0xd94   :  { %v1847_v34 = vpop.permute.xlu1 %1846 }
 0xd9b   :  { %v2379_v32 = vpop.eup %2378 }
 0xd9c   :  { %v1693_v33 = vmul.f32 %v2379_v32, %v2377_v13 }
 0xd9e   :  { %2302 = vmatmul.mubr.msk.f32.vlgmr.msra.gmra.mrb[20].mxu1 %vm171_vm2, %v1693_v33 }
 0xd9f   :  { %2310 = vmatpush3.xpose.msk.msra.mxu1 %vm171_vm2, %v1847_v34  ;;  %2311 = vmatprep.mubr.msk.f32.mxu1 %vm2484_vm1, %v2483_v8 }
 0xda0   :  { %2319 = vmatprep.subr.mxu1 %v2483_v8 }
 0xda2   :  { %2312 = vmatmul.mubr.msk.f32.vlgmr.msra.gmra.mrb[22].mxu1 %vm171_vm2, %v1845_v35 }
 0xda3   :  { %2320 = vmatpush3.msra.mxu1 %v2711_v37  ;;  %2321 = vmatprep.mubr.msk.f32.mxu1 %vm2484_vm1, %v2483_v8 }
 0xe71   :  { %v1766_v36 = vpop.f32.mrb[20].mxu1 }
 0xe72   :  { %v2303_v38 = vpop.f32.mrb[21].mxu1  ;;  %2307 = vmatmul.mubr.msk.f32.vlgmr.msra.gmra.mrb[20].mxu0 %vm171_vm2, %v1766_v36 }
 0xe73   :  { %2316 = vmatprep.mubr.msk.f32.mxu0 %vm2484_vm1, %v2483_v8 }
 0xe75   :  { %v1918_v39 = vpop.f32.mrb[22].mxu1 }
 0xe76   :  { %v1919_v41 = vadd.f32 %v1918_v39, %v2612_v21  ;;  %v2313_v40 = vpop.f32.mrb[23].mxu1 }
 0xe78   :  { %v1922_v42 = vsel %vm171_vm2, %v1919_v41, -inf }
 0xe79   :  { %1923 = vmax.xlane.f32.xlu1 %v1922_v42 }
 0xf06   :  { %v1924_v43 = vpop.xlane.xlu1 %1923 }
 0xf07   :  { %v1925_v44 = vsub.f32 %v1919_v41, %v1924_v43 }
 0xf09   :  { %v1926_v37 = vmul.f32 1.442695, %v1925_v44 }
 0xf0b   :  { %2380 = vpow2.f32 %v1926_v37 }
 0xf15   :  { %v2381_v45 = vpop.eup %2380 }
 0xf16   :  { %v1928_v46 = vsel %vm171_vm2, %v2381_v45, 0.0 }
 0xf17   :  { %1929 = vadd.xlane.f32.xlu0 %v1928_v46 }
 0xf2d   :  { %1933 = vrot.lane.b32.xlu0 %v2591_v11, %s2496_s16 }
 0xf45   :  { %v1839_v47 = vpop.f32.mrb[20].mxu0 }
 0xf46   :  { %v1843_v8 = vadd.f32 %v1839_v47, %v1602_v20  ;;  %v2308_v48 = vpop.f32.mrb[21].mxu0 }
 0xfa4   :  { %v1930_v50 = vpop.xlane.xlu0 %1929 }
 0xfa5   :  { %2382 = vrcp.f32 %v1930_v50 }
 0xfa8   :  { %v1934_v21 = vpop.permute.xlu0 %1933 }
 0xfa9   :  { %2315 = vmatpush3.msra.mxu0 %v1934_v21 }
 0xfaf   :  { %v2383_v51 = vpop.eup %2382 }
 0xfb0   :  { %v1932_v52 = vmul.f32 %v2383_v51, %v2381_v45 }
 0xfb2   :  { %2317 = vmatmul.mubr.msk.f32.vlgmr.msra.gmra.mrb[22].mxu0 %vm171_vm2, %v1932_v52 }
0x1085   :  { %v2005_v53 = vpop.f32.mrb[22].mxu0 }
0x1086   :  { %v2318_v54 = vpop.f32.mrb[23].mxu0  ;;  %2322 = vmatmul.mubr.msk.f32.vlgmr.msra.gmra.mrb[24].mxu1 %vm171_vm2, %v2005_v53 }
0x1159   :  { %v2078_v55 = vpop.f32.mrb[24].mxu1 }
0x115a   :  { %v2082_v56 = vadd.f32 %v2078_v55, %v1843_v8  ;;  %v2323_v11 = vpop.f32.mrb[25].mxu1 }
0x115c   :  { %v2083_v57 = vadd.f32 %v2736_v60, %v2082_v56 }
0x115e   :  { %2084 = vst.msk [vmem:[#allocation8 + $0x8] sm:$0xff] %vm75_vm0, %v2083_v57 }
0x115f   :  { %2461 = shalt.err (!%p2458_p0)
}
0x1160   :  { %s2462_s23 = scalar_lea.hbm %s2813_s5, 256 }
0x1161   :  { %p2463_p1 = scmp.ne.s32.totalorder %s2813_s5, %s2462_s23  ;;  %p2466_p2 = scmp.lt.u32.totalorder %s2462_s23, %s2813_s5 }
0x1163   :  { %p2468_p3 = pnand %p2466_p2, %p2463_p1 }
0x1165   :  { %2471 = shalt.err (!%p2468_p3)
}
0x1166   :  { %2096 = dma.vmem_to_hbm [thread:$0]  %s2091_s18, 256, %s2813_s5, [#allocation4], %s2480_s30, %s2480_s30, %s2481_s6  }
0x1167   :  { %2476 = dma.done.wait [#allocation4], 256  }
0x1168   :  { %2477 = vsyncadd [#allocation4], 4294967040 }
0x1169   :  { %2100 = vsyncpa [#allocation3], 1 }
0x116a   :  { %2101 = vsyncpa [#allocation6], 1 }
0x116b   :  { %2102 = vsyncpa [#allocation4], 1 }

</bundles_post_ra>
